<compile_context>
chip_gen: v7x
topology: tpu7x:2x2x1
jax: 0.10.0
libtpu: 0.0.40
codegen_flags: <defaults>
</compile_context>

<pallas_src>
import functools

import jax
import jax.numpy as jnp
from jax.experimental import pallas as pl
from jax.experimental.pallas import tpu as pltpu

IN_DIM = 32 * 32 * 3   # 3072
H1 = 64
H2 = 32
NUM_CLASSES = 10


def _round_up(x, m):
    return ((x + m - 1) // m) * m


def _ceil_div(a, b):
    return -(-a // b)


def fnn_kernel(x_ref, w1_ref, b1_ref, w2_ref, b2_ref, w3_ref, b3_ref, o_ref):
    # fc1: cast the f32 x tile to bf16 in-kernel (VPU work hidden under the
    # x DMA); w1 arrives pre-cast bf16; accumulate in f32 on the MXU.
    xb = x_ref[...].astype(jnp.bfloat16)
    h1 = jnp.dot(xb, w1_ref[...], preferred_element_type=jnp.float32)
    h1 = jnp.tanh(h1 + b1_ref[...])
    # fc2 + relu: bf16 operands, f32 accumulate (negligible FLOPs).
    h2 = jnp.dot(h1.astype(jnp.bfloat16), w2_ref[...],
                 preferred_element_type=jnp.float32)
    h2 = jnp.maximum(h2 + b2_ref[...], 0.0)
    # fc3 + softmax (dim=1) with exact normalization.
    logits = jnp.dot(h2.astype(jnp.bfloat16), w3_ref[...],
                     preferred_element_type=jnp.float32)
    logits = logits + b3_ref[...]
    m = jnp.max(logits, axis=1, keepdims=True)
    e = jnp.exp(logits - m)
    s = jnp.sum(e, axis=1, keepdims=True)
    o_ref[...] = e / s


@functools.partial(jax.jit, static_argnames=("block_n",))
def fnn_forward(x, w1, b1, w2, b2, w3, b3, *, block_n=1024):
    n = x.shape[0]
    x = x.reshape(n, IN_DIM)   # torch x.view(N, -1)

    # Batch tile: as large as block_n allows (sublane-aligned). If the grid
    # has more than one step, prefer an even step count (v7x has 2 TCs).
    bn = min(block_n, _round_up(n, 8))
    steps = _ceil_div(n, bn)
    if steps > 1 and steps % 2 == 1:
        bn = _round_up(_ceil_div(n, steps + 1), 8)
        steps = _ceil_div(n, bn)

    return pl.pallas_call(
        fnn_kernel,
        out_shape=jax.ShapeDtypeStruct((n, NUM_CLASSES), jnp.float32),
        grid_spec=pltpu.PrefetchScalarGridSpec(
            num_scalar_prefetch=0,
            grid=(steps,),
            in_specs=[
                pl.BlockSpec((bn, IN_DIM), lambda i: (i, 0)),        # x tile (f32)
                pl.BlockSpec((IN_DIM, H1), lambda i: (0, 0)),        # w1 (bf16)
                pl.BlockSpec((1, H1), lambda i: (0, 0)),             # b1 (f32)
                pl.BlockSpec((H1, H2), lambda i: (0, 0)),            # w2 (bf16)
                pl.BlockSpec((1, H2), lambda i: (0, 0)),             # b2 (f32)
                pl.BlockSpec((H2, NUM_CLASSES), lambda i: (0, 0)),   # w3 (bf16)
                pl.BlockSpec((1, NUM_CLASSES), lambda i: (0, 0)),    # b3 (f32)
            ],
            out_specs=pl.BlockSpec((bn, NUM_CLASSES), lambda i: (i, 0)),
        ),
        compiler_params=pltpu.CompilerParams(
            dimension_semantics=("parallel",),
            vmem_limit_bytes=48 * 1024 * 1024,
        ),
    )(x, w1, b1, w2, b2, w3, b3)


def init_params(key):
    """nn.Linear-style uniform(-1/sqrt(fan_in), +) init.

    Weights are pre-cast to bf16 once here (not per call in the jitted
    wrapper); biases stay f32.
    """
    ks = jax.random.split(key, 6)

    def linear(kw, kb, fan_in, fan_out):
        bound = 1.0 / jnp.sqrt(fan_in)
        w = jax.random.uniform(kw, (fan_in, fan_out), jnp.float32, -bound, bound)
        b = jax.random.uniform(kb, (1, fan_out), jnp.float32, -bound, bound)
        return w.astype(jnp.bfloat16), b

    w1, b1 = linear(ks[0], ks[1], IN_DIM, H1)
    w2, b2 = linear(ks[2], ks[3], H1, H2)
    w3, b3 = linear(ks[4], ks[5], H2, NUM_CLASSES)
    return w1, b1, w2, b2, w3, b3


def fnn_reference_f32(x, w1, b1, w2, b2, w3, b3):
    """Pure-JAX f32-compute reference (same bf16-stored weights, f32 math)."""
    h1 = jnp.tanh(x @ w1.astype(jnp.float32) + b1)
    h2 = jax.nn.relu(h1 @ w2.astype(jnp.float32) + b2)
    return jax.nn.softmax(h2 @ w3.astype(jnp.float32) + b3, axis=1)


if __name__ == "__main__":
    key = jax.random.PRNGKey(0)
    k_param, k_x = jax.random.split(key)

    params = init_params(k_param)
    batch = 8
    x = jax.random.normal(k_x, (batch, IN_DIM), dtype=jnp.float32)

    out = fnn_forward(x, *params)
    out = jax.block_until_ready(out)

    ref = fnn_reference_f32(x, *params)
    assert out.shape == (batch, NUM_CLASSES)
    # Exact-divide softmax: rows sum to 1 (up to f32 rounding).
    assert jnp.allclose(jnp.sum(out, axis=1), 1.0, atol=1e-5)
    # bf16 activations in the kernel vs f32 reference: small drift budget.
    assert jnp.allclose(out, ref, atol=5e-3, rtol=5e-3)

    print("KERNEL_OK")
</pallas_src>

<mosaic_0001>
module attributes {stable_mosaic.version = 11 : i64} {
  func.func @fnn_kernel(%arg0: i32, %arg1: memref<8x3072xf32, #tpu.memory_space<vmem>>, %arg2: memref<3072x64xbf16, #tpu.memory_space<vmem>>, %arg3: memref<1x64xf32, #tpu.memory_space<vmem>>, %arg4: memref<64x32xbf16, #tpu.memory_space<vmem>>, %arg5: memref<1x32xf32, #tpu.memory_space<vmem>>, %arg6: memref<32x10xbf16, #tpu.memory_space<vmem>>, %arg7: memref<1x10xf32, #tpu.memory_space<vmem>>, %arg8: memref<8x10xf32, #tpu.memory_space<vmem>>) attributes {dimension_semantics = [#tpu.dimension_semantics<parallel>], iteration_bounds = array<i64: 1>, scalar_prefetch = 0 : i64, scratch_operands = 0 : i64, tpu.core_type = #tpu.core_type<tc>, window_params = [{transform_indices = @transform_0, window_bounds = array<i64: 8, 3072>}, {pipeline_mode = #tpu.pipeline_mode<synchronous>, transform_indices = @transform_1, window_bounds = array<i64: 3072, 64>}, {pipeline_mode = #tpu.pipeline_mode<synchronous>, transform_indices = @transform_2, window_bounds = array<i64: 1, 64>}, {pipeline_mode = #tpu.pipeline_mode<synchronous>, transform_indices = @transform_3, window_bounds = array<i64: 64, 32>}, {pipeline_mode = #tpu.pipeline_mode<synchronous>, transform_indices = @transform_4, window_bounds = array<i64: 1, 32>}, {pipeline_mode = #tpu.pipeline_mode<synchronous>, transform_indices = @transform_5, window_bounds = array<i64: 32, 10>}, {pipeline_mode = #tpu.pipeline_mode<synchronous>, transform_indices = @transform_6, window_bounds = array<i64: 1, 10>}, {transform_indices = @transform_7, window_bounds = array<i64: 8, 10>}]} {
    %c0 = arith.constant 0 : index
    %c0_0 = arith.constant 0 : index
    %0 = vector.load %arg1[%c0, %c0_0] : memref<8x3072xf32, #tpu.memory_space<vmem>>, vector<8x3072xf32>
    %1 = arith.truncf %0 : vector<8x3072xf32> to vector<8x3072xbf16>
    %c0_1 = arith.constant 0 : index
    %c0_2 = arith.constant 0 : index
    %2 = vector.load %arg2[%c0_1, %c0_2] : memref<3072x64xbf16, #tpu.memory_space<vmem>>, vector<3072x64xbf16>
    %cst = arith.constant dense<0.000000e+00> : vector<8x64xf32>
    %3 = tpu.matmul %1, %2, %cst {dimension_numbers = #tpu.dot_dimension_numbers<[1], [0], [0], [1], [0, 0, 1, 1], [], []>} : vector<8x3072xbf16>, vector<3072x64xbf16>, vector<8x64xf32> -> vector<8x64xf32>
    %c0_3 = arith.constant 0 : index
    %c0_4 = arith.constant 0 : index
    %4 = vector.load %arg3[%c0_3, %c0_4] : memref<1x64xf32, #tpu.memory_space<vmem>>, vector<1x64xf32>
    %5 = vector.broadcast %4 : vector<1x64xf32> to vector<8x64xf32>
    %6 = arith.addf %3, %5 : vector<8x64xf32>
    %7 = math.tanh %6 : vector<8x64xf32>
    %8 = arith.truncf %7 : vector<8x64xf32> to vector<8x64xbf16>
    %c0_5 = arith.constant 0 : index
    %c0_6 = arith.constant 0 : index
    %9 = vector.load %arg4[%c0_5, %c0_6] : memref<64x32xbf16, #tpu.memory_space<vmem>>, vector<64x32xbf16>
    %cst_7 = arith.constant dense<0.000000e+00> : vector<8x32xf32>
    %10 = tpu.matmul %8, %9, %cst_7 {dimension_numbers = #tpu.dot_dimension_numbers<[1], [0], [0], [1], [0, 0, 1, 1], [], []>} : vector<8x64xbf16>, vector<64x32xbf16>, vector<8x32xf32> -> vector<8x32xf32>
    %c0_8 = arith.constant 0 : index
    %c0_9 = arith.constant 0 : index
    %11 = vector.load %arg5[%c0_8, %c0_9] : memref<1x32xf32, #tpu.memory_space<vmem>>, vector<1x32xf32>
    %12 = vector.broadcast %11 : vector<1x32xf32> to vector<8x32xf32>
    %13 = arith.addf %10, %12 : vector<8x32xf32>
    %cst_10 = arith.constant 0.000000e+00 : f32
    %14 = vector.broadcast %cst_10 : f32 to vector<8x32xf32>
    %15 = arith.maximumf %13, %14 : vector<8x32xf32>
    %16 = arith.truncf %15 : vector<8x32xf32> to vector<8x32xbf16>
    %c0_11 = arith.constant 0 : index
    %c0_12 = arith.constant 0 : index
    %17 = vector.load %arg6[%c0_11, %c0_12] : memref<32x10xbf16, #tpu.memory_space<vmem>>, vector<32x10xbf16>
    %cst_13 = arith.constant dense<0.000000e+00> : vector<8x10xf32>
    %18 = tpu.matmul %16, %17, %cst_13 {dimension_numbers = #tpu.dot_dimension_numbers<[1], [0], [0], [1], [0, 0, 1, 1], [], []>} : vector<8x32xbf16>, vector<32x10xbf16>, vector<8x10xf32> -> vector<8x10xf32>
    %c0_14 = arith.constant 0 : index
    %c0_15 = arith.constant 0 : index
    %19 = vector.load %arg7[%c0_14, %c0_15] : memref<1x10xf32, #tpu.memory_space<vmem>>, vector<1x10xf32>
    %20 = vector.broadcast %19 : vector<1x10xf32> to vector<8x10xf32>
    %21 = arith.addf %18, %20 : vector<8x10xf32>
    %cst_16 = arith.constant dense<0xFF800000> : vector<8xf32>
    %22 = vector.multi_reduction <maximumf>, %21, %cst_16 [1] : vector<8x10xf32> to vector<8xf32>
    %23 = vector.shape_cast %22 : vector<8xf32> to vector<8x1xf32>
    %24 = vector.broadcast %23 : vector<8x1xf32> to vector<8x10xf32>
    %25 = arith.subf %21, %24 : vector<8x10xf32>
    %26 = math.exp %25 : vector<8x10xf32>
    %cst_17 = arith.constant dense<0.000000e+00> : vector<8xf32>
    %27 = vector.multi_reduction <add>, %26, %cst_17 [1] : vector<8x10xf32> to vector<8xf32>
    %28 = vector.shape_cast %27 : vector<8xf32> to vector<8x1xf32>
    %29 = vector.broadcast %28 : vector<8x1xf32> to vector<8x10xf32>
    %30 = arith.divf %26, %29 : vector<8x10xf32>
    %c0_18 = arith.constant 0 : index
    %c0_19 = arith.constant 0 : index
    %31 = vector.load %arg8[%c0_18, %c0_19] : memref<8x10xf32, #tpu.memory_space<vmem>>, vector<8x10xf32>
    tpu.vector_store %arg8[%c0_18, %c0_19], %30 {strides = array<i32>} : memref<8x10xf32, #tpu.memory_space<vmem>>, vector<8x10xf32>,
    return
  }
  func.func @transform_0(%arg0: i32) -> (i32, i32) {
    %c0_i32 = arith.constant 0 : i32
    %c0_i32_0 = arith.constant 0 : i32
    return %arg0, %c0_i32 : i32, i32
  }
  func.func @transform_1(%arg0: i32) -> (i32, i32) {
    %c0_i32 = arith.constant 0 : i32
    %c0_i32_0 = arith.constant 0 : i32
    %c0_i32_1 = arith.constant 0 : i32
    return %c0_i32, %c0_i32_0 : i32, i32
  }
  func.func @transform_2(%arg0: i32) -> (i32, i32) {
    %c0_i32 = arith.constant 0 : i32
    %c0_i32_0 = arith.constant 0 : i32
    %c0_i32_1 = arith.constant 0 : i32
    return %c0_i32, %c0_i32_0 : i32, i32
  }
  func.func @transform_3(%arg0: i32) -> (i32, i32) {
    %c0_i32 = arith.constant 0 : i32
    %c0_i32_0 = arith.constant 0 : i32
    %c0_i32_1 = arith.constant 0 : i32
    return %c0_i32, %c0_i32_0 : i32, i32
  }
  func.func @transform_4(%arg0: i32) -> (i32, i32) {
    %c0_i32 = arith.constant 0 : i32
    %c0_i32_0 = arith.constant 0 : i32
    %c0_i32_1 = arith.constant 0 : i32
    return %c0_i32, %c0_i32_0 : i32, i32
  }
  func.func @transform_5(%arg0: i32) -> (i32, i32) {
    %c0_i32 = arith.constant 0 : i32
    %c0_i32_0 = arith.constant 0 : i32
    %c0_i32_1 = arith.constant 0 : i32
    return %c0_i32, %c0_i32_0 : i32, i32
  }
  func.func @transform_6(%arg0: i32) -> (i32, i32) {
    %c0_i32 = arith.constant 0 : i32
    %c0_i32_0 = arith.constant 0 : i32
    %c0_i32_1 = arith.constant 0 : i32
    return %c0_i32, %c0_i32_0 : i32, i32
  }
  func.func @transform_7(%arg0: i32) -> (i32, i32) {
    %c0_i32 = arith.constant 0 : i32
    %c0_i32_0 = arith.constant 0 : i32
    return %arg0, %c0_i32 : i32, i32
  }
}

</mosaic_0001>

<bundles_post_ra>
// kernel: fnn_forward.1
= control target key start
LH: loop header
LB: loop body
LE: loop exit
PB: predicated region body
PF: predicated region fallthrough
CT: control target
= control target key end

     0   :  { %s3739_s0 = inlined_call_operand.vmem [shape: f32[8,3072], index: 0, kind: input, shape index: {}]   ;;  %s3740_s1 = inlined_call_operand.vmem [shape: bf16[3072,64], index: 1, kind: input, shape index: {}]   ;;  %s3741_s2 = inlined_call_operand.vmem [shape: f32[1,64], index: 2, kind: input, shape index: {}]   ;;  %s3742_s3 = inlined_call_operand.vmem [shape: bf16[64,32], index: 3, kind: input, shape index: {}]   ;;  %s3743_s4 = inlined_call_operand.vmem [shape: f32[1,32], index: 4, kind: input, shape index: {}]   ;;  %s3744_s5 = inlined_call_operand.vmem [shape: bf16[32,10], index: 5, kind: input, shape index: {}]   ;;  %s3745_s6 = inlined_call_operand.vmem [shape: f32[1,10], index: 6, kind: input, shape index: {}]   ;;  %s3746_s7 = inlined_call_operand.hbm [shape: f32[8,10], index: 7, kind: output, shape index: {}]  }
   0x1   :  { %v2778_v0 = vld [vmem:[%s3740_s1 + $0x40] sm:$0xff]   ;;  %v2782_v4 = vld [vmem:[%s3740_s1 + $0x48] sm:$0xff]   ;;  %v2786_v8 = vld [vmem:[%s3740_s1 + $0x50] sm:$0xff]  }
   0x2   :  { %v2779_v1 = vld [vmem:[%s3740_s1 + $0xc0] sm:$0xff]   ;;  %2483 = vmatprep.subr.bf16.mxu0 %v2778_v0  ;;  %v2783_v5 = vld [vmem:[%s3740_s1 + $0xc8] sm:$0xff]   ;;  %v2787_v9 = vld [vmem:[%s3740_s1 + $0xd0] sm:$0xff]  }
   0x3   :  { %v2780_v2 = vld [vmem:[%s3740_s1] sm:$0xff]   ;;  %2505 = vmatprep.subr.bf16.mxu1 %v2779_v1  ;;  %v2784_v6 = vld [vmem:[%s3740_s1 + $0x8] sm:$0xff]   ;;  %v2788_v10 = vld [vmem:[%s3740_s1 + $0x10] sm:$0xff]  }
   0x4   :  { %v2781_v3 = vld [vmem:[%s3740_s1 + $0x80] sm:$0xff]   ;;  %2484 = vmatpush3.bf16.msra.mxu0 %v2780_v2  ;;  %v2785_v7 = vld [vmem:[%s3740_s1 + $0x88] sm:$0xff]   ;;  %v2789_v11 = vld [vmem:[%s3740_s1 + $0x90] sm:$0xff]  }
   0x5   :  { %2506 = vmatpush3.bf16.msra.mxu1 %v2781_v3  ;;  %2485 = vmatprep.subr.bf16.mxu0 %v2782_v4  ;;  %v2790_v12 = vld [vmem:[%s3740_s1 + $0x58] sm:$0xff]   ;;  %v2794_v16 = vld [vmem:[%s3740_s1 + $0x60] sm:$0xff]   ;;  %v2798_v20 = vld [vmem:[%s3740_s1 + $0x68] sm:$0xff]  }
   0x6   :  { %2507 = vmatprep.subr.bf16.mxu1 %v2783_v5  ;;  %v2791_v13 = vld [vmem:[%s3740_s1 + $0xd8] sm:$0xff]   ;;  %v2795_v17 = vld [vmem:[%s3740_s1 + $0xe0] sm:$0xff]   ;;  %v2799_v21 = vld [vmem:[%s3740_s1 + $0xe8] sm:$0xff]  }
   0x7   :  { %v2792_v14 = vld [vmem:[%s3740_s1 + $0x18] sm:$0xff]   ;;  %v2796_v18 = vld [vmem:[%s3740_s1 + $0x20] sm:$0xff]   ;;  %v2800_v22 = vld [vmem:[%s3740_s1 + $0x28] sm:$0xff]  }
   0x8   :  { %2486 = vmatpush3.bf16.msra.mxu0 %v2784_v6  ;;  %v2793_v15 = vld [vmem:[%s3740_s1 + $0x98] sm:$0xff]   ;;  %v2797_v19 = vld [vmem:[%s3740_s1 + $0xa0] sm:$0xff]   ;;  %v2801_v23 = vld [vmem:[%s3740_s1 + $0xa8] sm:$0xff]  }
   0x9   :  { %2508 = vmatpush3.bf16.msra.mxu1 %v2785_v7  ;;  %2487 = vmatprep.subr.bf16.mxu0 %v2786_v8  ;;  %v2802_v24 = vld [vmem:[%s3740_s1 + $0x70] sm:$0xff]   ;;  %v2806_v28 = vld [vmem:[%s3740_s1 + $0x78] sm:$0xff]   ;;  %v29_v32 = vld [vmem:[%s3739_s0 + $0x8] sm:$0xff] }
   0xa   :  { %2509 = vmatprep.subr.bf16.mxu1 %v2787_v9  ;;  %v2803_v25 = vld [vmem:[%s3740_s1 + $0xf0] sm:$0xff]   ;;  %v2807_v29 = vld [vmem:[%s3740_s1 + $0xf8] sm:$0xff]   ;;  %v28_v34 = vld [vmem:[%s3739_s0] sm:$0xff]  ;;  %v53_v35 = vpack.c.bf16 %v29_v32, %v29_v32 }
   0xb   :  { %v2804_v26 = vld [vmem:[%s3740_s1 + $0x30] sm:$0xff]   ;;  %v2808_v30 = vld [vmem:[%s3740_s1 + $0x38] sm:$0xff]   ;;  %v52_v37 = vpack.c.bf16 %v28_v34, %v28_v34  ;;  %v2810_v40 = vld [vmem:[%s3740_s1 + $0x140] sm:$0xff]  }
   0xc   :  { %2488 = vmatpush3.bf16.msra.mxu0 %v2788_v10  ;;  %v2805_v27 = vld [vmem:[%s3740_s1 + $0xb0] sm:$0xff]   ;;  %v2809_v31 = vld [vmem:[%s3740_s1 + $0xb8] sm:$0xff]   ;;  %1651 = vmatprep.mubr.bf16.mxu0 %v53_v35  ;;  %v2811_v41 = vld [vmem:[%s3740_s1 + $0x1c0] sm:$0xff]  }
   0xd   :  { %2510 = vmatpush3.bf16.msra.mxu1 %v2789_v11  ;;  %2489 = vmatprep.subr.bf16.mxu0 %v2790_v12  ;;  %v31_v33 = vld [vmem:[%s3739_s0 + $0x18] sm:$0xff]  ;;  %v30_v38 = vld [vmem:[%s3739_s0 + $0x10] sm:$0xff]  ;;  %v2812_v42 = vld [vmem:[%s3740_s1 + $0x100] sm:$0xff]  }
   0xe   :  { %2511 = vmatprep.subr.bf16.mxu1 %v2791_v13  ;;  %v55_v36 = vpack.c.bf16 %v31_v33, %v31_v33  ;;  %v54_v39 = vpack.c.bf16 %v30_v38, %v30_v38  ;;  %v2813_v43 = vld [vmem:[%s3740_s1 + $0x180] sm:$0xff]   ;;  %v2814_v44 = vld [vmem:[%s3740_s1 + $0x148] sm:$0xff]   ;;  %v2818_v48 = vld [vmem:[%s3740_s1 + $0x150] sm:$0xff]  }
   0xf   :  { %v2815_v45 = vld [vmem:[%s3740_s1 + $0x1c8] sm:$0xff]   ;;  %v2819_v49 = vld [vmem:[%s3740_s1 + $0x1d0] sm:$0xff]   ;;  %v2822_v52 = vld [vmem:[%s3740_s1 + $0x158] sm:$0xff]  }
  0x10   :  { %2490 = vmatpush3.bf16.msra.mxu0 %v2792_v14  ;;  %1691 = vmatprep.mubr.bf16.mxu1 %v55_v36  ;;  %v2816_v46 = vld [vmem:[%s3740_s1 + $0x108] sm:$0xff]   ;;  %v2820_v50 = vld [vmem:[%s3740_s1 + $0x110] sm:$0xff]   ;;  %v2823_v53 = vld [vmem:[%s3740_s1 + $0x1d8] sm:$0xff]  }
  0x11   :  { %2512 = vmatpush3.bf16.msra.mxu1 %v2793_v15  ;;  %2491 = vmatprep.subr.bf16.mxu0 %v2794_v16  ;;  %v2817_v47 = vld [vmem:[%s3740_s1 + $0x188] sm:$0xff]   ;;  %v2821_v51 = vld [vmem:[%s3740_s1 + $0x190] sm:$0xff]   ;;  %v2824_v54 = vld [vmem:[%s3740_s1 + $0x118] sm:$0xff]  }
  0x12   :  { %2513 = vmatprep.subr.bf16.mxu1 %v2795_v17  ;;  %v2825_v55 = vld [vmem:[%s3740_s1 + $0x198] sm:$0xff]   ;;  %v2826_v56 = vld [vmem:[%s3740_s1 + $0x160] sm:$0xff]   ;;  %v2830_v60 = vld [vmem:[%s3740_s1 + $0x168] sm:$0xff]  }
  0x13   :  { %v2827_v57 = vld [vmem:[%s3740_s1 + $0x1e0] sm:$0xff]   ;;  %v2831_v61 = vld [vmem:[%s3740_s1 + $0x1e8] sm:$0xff]   ;;  %v2834_v0 = vld [vmem:[%s3740_s1 + $0x170] sm:$0xff]  }
  0x14   :  { %2492 = vmatpush3.bf16.msra.mxu0 %v2796_v18  ;;  %v2828_v58 = vld [vmem:[%s3740_s1 + $0x120] sm:$0xff]   ;;  %v2832_v62 = vld [vmem:[%s3740_s1 + $0x128] sm:$0xff]   ;;  %v2835_v1 = vld [vmem:[%s3740_s1 + $0x1f0] sm:$0xff]  }
  0x15   :  { %2514 = vmatpush3.bf16.msra.mxu1 %v2797_v19  ;;  %2493 = vmatprep.subr.bf16.mxu0 %v2798_v20  ;;  %v2829_v59 = vld [vmem:[%s3740_s1 + $0x1a0] sm:$0xff]   ;;  %v2833_v63 = vld [vmem:[%s3740_s1 + $0x1a8] sm:$0xff]   ;;  %v2836_v2 = vld [vmem:[%s3740_s1 + $0x130] sm:$0xff]  }
  0x16   :  { %2515 = vmatprep.subr.bf16.mxu1 %v2799_v21  ;;  %v2837_v3 = vld [vmem:[%s3740_s1 + $0x1b0] sm:$0xff]   ;;  %v2838_v4 = vld [vmem:[%s3740_s1 + $0x178] sm:$0xff]   ;;  %v33_v8 = vld [vmem:[%s3739_s0 + $0x28] sm:$0xff] }
  0x17   :  { %v2839_v5 = vld [vmem:[%s3740_s1 + $0x1f8] sm:$0xff]   ;;  %v57_v10 = vpack.c.bf16 %v33_v8, %v33_v8  ;;  %v32_v12 = vld [vmem:[%s3739_s0 + $0x20] sm:$0xff]  ;;  %v34_v13 = vld [vmem:[%s3739_s0 + $0x30] sm:$0xff] }
  0x18   :  { %2494 = vmatpush3.bf16.msra.mxu0 %v2800_v22  ;;  %v2840_v6 = vld [vmem:[%s3740_s1 + $0x138] sm:$0xff]   ;;  %v56_v14 = vpack.c.bf16 %v32_v12, %v32_v12  ;;  %v58_v15 = vpack.c.bf16 %v34_v13, %v34_v13  ;;  %v2842_v16 = vld [vmem:[%s3740_s1 + $0x240] sm:$0xff]   ;;  %v2846_v20 = vld [vmem:[%s3740_s1 + $0x248] sm:$0xff]  }
  0x19   :  { %2516 = vmatpush3.bf16.msra.mxu1 %v2801_v23  ;;  %2495 = vmatprep.subr.bf16.mxu0 %v2802_v24  ;;  %v2841_v7 = vld [vmem:[%s3740_s1 + $0x1b8] sm:$0xff]   ;;  %v2843_v17 = vld [vmem:[%s3740_s1 + $0x2c0] sm:$0xff]   ;;  %v2847_v21 = vld [vmem:[%s3740_s1 + $0x2c8] sm:$0xff]  }
  0x1a   :  { %2517 = vmatprep.subr.bf16.mxu1 %v2803_v25  ;;  %v35_v9 = vld [vmem:[%s3739_s0 + $0x38] sm:$0xff]  ;;  %v2844_v18 = vld [vmem:[%s3740_s1 + $0x200] sm:$0xff]   ;;  %v2848_v22 = vld [vmem:[%s3740_s1 + $0x208] sm:$0xff]  }
  0x1b   :  { %v59_v11 = vpack.c.bf16 %v35_v9, %v35_v9  ;;  %v2845_v19 = vld [vmem:[%s3740_s1 + $0x280] sm:$0xff]   ;;  %v2849_v23 = vld [vmem:[%s3740_s1 + $0x288] sm:$0xff]   ;;  %v2850_v24 = vld [vmem:[%s3740_s1 + $0x250] sm:$0xff]  }
  0x1c   :  { %2496 = vmatpush3.bf16.msra.mxu0 %v2804_v26  ;;  %v2851_v25 = vld [vmem:[%s3740_s1 + $0x2d0] sm:$0xff]   ;;  %v2858_v32 = vld [vmem:[%s3740_s1 + $0x260] sm:$0xff]   ;;  %v2862_v36 = vld [vmem:[%s3740_s1 + $0x268] sm:$0xff]  }
  0x1d   :  { %2518 = vmatpush3.bf16.msra.mxu1 %v2805_v27  ;;  %2497 = vmatprep.subr.bf16.mxu0 %v2806_v28  ;;  %v2852_v26 = vld [vmem:[%s3740_s1 + $0x210] sm:$0xff]   ;;  %v2854_v28 = vld [vmem:[%s3740_s1 + $0x258] sm:$0xff]   ;;  %v2859_v33 = vld [vmem:[%s3740_s1 + $0x2e0] sm:$0xff]  }
  0x1e   :  { %2519 = vmatprep.subr.bf16.mxu1 %v2807_v29  ;;  %v2853_v27 = vld [vmem:[%s3740_s1 + $0x290] sm:$0xff]   ;;  %v2855_v29 = vld [vmem:[%s3740_s1 + $0x2d8] sm:$0xff]   ;;  %v2860_v34 = vld [vmem:[%s3740_s1 + $0x220] sm:$0xff]  }
  0x1f   :  { %v2861_v35 = vld [vmem:[%s3740_s1 + $0x2a0] sm:$0xff]   ;;  %v2864_v38 = vld [vmem:[%s3740_s1 + $0x228] sm:$0xff]  }
  0x20   :  { %2498 = vmatpush3.bf16.msra.mxu0 %v2808_v30  ;;  %v2856_v30 = vld [vmem:[%s3740_s1 + $0x218] sm:$0xff]   ;;  %v2890_v8 = vld [vmem:[%s3740_s1 + $0x360] sm:$0xff]   ;;  %v2894_v12 = vld [vmem:[%s3740_s1 + $0x368] sm:$0xff]  }
  0x21   :  { %2520 = vmatpush3.bf16.msra.mxu1 %v2809_v31  ;;  %2527 = vmatprep.subr.bf16.mxu0 %v2810_v40  ;;  %v2857_v31 = vld [vmem:[%s3740_s1 + $0x298] sm:$0xff]   ;;  %v2866_v40 = vld [vmem:[%s3740_s1 + $0x270] sm:$0xff]   ;;  %v2891_v9 = vld [vmem:[%s3740_s1 + $0x3e0] sm:$0xff]  }
  0x22   :  { %2549 = vmatprep.subr.bf16.mxu1 %v2811_v41  ;;  %v2867_v41 = vld [vmem:[%s3740_s1 + $0x2f0] sm:$0xff]   ;;  %v2895_v13 = vld [vmem:[%s3740_s1 + $0x3e8] sm:$0xff]  }
  0x23   :  { %1652 = vmatmul.mubr.bf16.vlgmr.msra.gmra.mrb[0].mxu0 %v52_v37  ;;  %v2863_v37 = vld [vmem:[%s3740_s1 + $0x2e8] sm:$0xff]  }
  0x24   :  { %1692 = vmatmul.mubr.bf16.vlgmr.msra.gmra.mrb[0].mxu1 %v54_v39  ;;  %2528 = vmatpush3.bf16.msra.mxu0 %v2812_v42  ;;  %v2865_v39 = vld [vmem:[%s3740_s1 + $0x2a8] sm:$0xff]   ;;  %v2868_v42 = vld [vmem:[%s3740_s1 + $0x230] sm:$0xff]  }
  0x25   :  { %2550 = vmatpush3.bf16.msra.mxu1 %v2813_v43  ;;  %2529 = vmatprep.subr.bf16.mxu0 %v2814_v44  ;;  %v2869_v43 = vld [vmem:[%s3740_s1 + $0x2b0] sm:$0xff]   ;;  %v2870_v44 = vld [vmem:[%s3740_s1 + $0x278] sm:$0xff]  }
  0x26   :  { %2551 = vmatprep.subr.bf16.mxu1 %v2815_v45  ;;  %1731 = vmatprep.mubr.bf16.mxu0 %v57_v10  ;;  %v2871_v45 = vld [vmem:[%s3740_s1 + $0x2f8] sm:$0xff]   ;;  %v2892_v10 = vld [vmem:[%s3740_s1 + $0x320] sm:$0xff]  }
  0x27   :  { %1771 = vmatprep.mubr.bf16.mxu1 %v59_v11  ;;  %v2893_v11 = vld [vmem:[%s3740_s1 + $0x3a0] sm:$0xff]  }
  0x28   :  { %2530 = vmatpush3.bf16.msra.mxu0 %v2816_v46  ;;  %v2872_v46 = vld [vmem:[%s3740_s1 + $0x238] sm:$0xff]  }
  0x29   :  { %2552 = vmatpush3.bf16.msra.mxu1 %v2817_v47  ;;  %2531 = vmatprep.subr.bf16.mxu0 %v2818_v48  ;;  %v2873_v47 = vld [vmem:[%s3740_s1 + $0x2b8] sm:$0xff]   ;;  %v37_v48 = vld [vmem:[%s3739_s0 + $0x48] sm:$0xff] }
  0x2a   :  { %2553 = vmatprep.subr.bf16.mxu1 %v2819_v49  ;;  %v61_v49 = vpack.c.bf16 %v37_v48, %v37_v48  ;;  %v2922_v48 = vld [vmem:[%s3740_s1 + $0x460] sm:$0xff]  }
  0x2c   :  { %2532 = vmatpush3.bf16.msra.mxu0 %v2820_v50  ;;  %v39_v50 = vld [vmem:[%s3739_s0 + $0x58] sm:$0xff] }
  0x2d   :  { %2554 = vmatpush3.bf16.msra.mxu1 %v2821_v51  ;;  %2533 = vmatprep.subr.bf16.mxu0 %v2822_v52  ;;  %v36_v51 = vld [vmem:[%s3739_s0 + $0x40] sm:$0xff]  ;;  %v38_v52 = vld [vmem:[%s3739_s0 + $0x50] sm:$0xff] }
  0x2e   :  { %2555 = vmatprep.subr.bf16.mxu1 %v2823_v53  ;;  %v63_v53 = vpack.c.bf16 %v39_v50, %v39_v50  ;;  %v2924_v50 = vld [vmem:[%s3740_s1 + $0x420] sm:$0xff]  }
  0x30   :  { %2534 = vmatpush3.bf16.msra.mxu0 %v2824_v54  ;;  %v60_v54 = vpack.c.bf16 %v36_v51, %v36_v51  ;;  %v2925_v51 = vld [vmem:[%s3740_s1 + $0x4a0] sm:$0xff]  }
  0x31   :  { %2556 = vmatpush3.bf16.msra.mxu1 %v2825_v55  ;;  %2535 = vmatprep.subr.bf16.mxu0 %v2826_v56  ;;  %v62_v55 = vpack.c.bf16 %v38_v52, %v38_v52  ;;  %v2874_v56 = vld [vmem:[%s3740_s1 + $0x340] sm:$0xff]   ;;  %v2926_v52 = vld [vmem:[%s3740_s1 + $0x468] sm:$0xff]  }
  0x32   :  { %2557 = vmatprep.subr.bf16.mxu1 %v2827_v57  ;;  %v2875_v57 = vld [vmem:[%s3740_s1 + $0x3c0] sm:$0xff]  }
  0x34   :  { %2536 = vmatpush3.bf16.msra.mxu0 %v2828_v58  ;;  %v2876_v58 = vld [vmem:[%s3740_s1 + $0x300] sm:$0xff]  }
  0x35   :  { %2558 = vmatpush3.bf16.msra.mxu1 %v2829_v59  ;;  %2537 = vmatprep.subr.bf16.mxu0 %v2830_v60  ;;  %v2877_v59 = vld [vmem:[%s3740_s1 + $0x380] sm:$0xff]   ;;  %v2878_v60 = vld [vmem:[%s3740_s1 + $0x348] sm:$0xff]  }
  0x36   :  { %2559 = vmatprep.subr.bf16.mxu1 %v2831_v61  ;;  %v2879_v61 = vld [vmem:[%s3740_s1 + $0x3c8] sm:$0xff]  }
  0x38   :  { %2538 = vmatpush3.bf16.msra.mxu0 %v2832_v62  ;;  %v2880_v62 = vld [vmem:[%s3740_s1 + $0x308] sm:$0xff]  }
  0x39   :  { %2560 = vmatpush3.bf16.msra.mxu1 %v2833_v63  ;;  %2539 = vmatprep.subr.bf16.mxu0 %v2834_v0  ;;  %v2881_v63 = vld [vmem:[%s3740_s1 + $0x388] sm:$0xff]   ;;  %v2882_v0 = vld [vmem:[%s3740_s1 + $0x350] sm:$0xff]  }
  0x3a   :  { %2561 = vmatprep.subr.bf16.mxu1 %v2835_v1  ;;  %v2883_v1 = vld [vmem:[%s3740_s1 + $0x3d0] sm:$0xff]  }
  0x3c   :  { %2540 = vmatpush3.bf16.msra.mxu0 %v2836_v2  ;;  %v2884_v2 = vld [vmem:[%s3740_s1 + $0x310] sm:$0xff]  }
  0x3d   :  { %2562 = vmatpush3.bf16.msra.mxu1 %v2837_v3  ;;  %2541 = vmatprep.subr.bf16.mxu0 %v2838_v4  ;;  %v2885_v3 = vld [vmem:[%s3740_s1 + $0x390] sm:$0xff]   ;;  %v2886_v4 = vld [vmem:[%s3740_s1 + $0x358] sm:$0xff]  }
  0x3e   :  { %2563 = vmatprep.subr.bf16.mxu1 %v2839_v5  ;;  %v2887_v5 = vld [vmem:[%s3740_s1 + $0x3d8] sm:$0xff]  }
  0x40   :  { %2542 = vmatpush3.bf16.msra.mxu0 %v2840_v6  ;;  %v2888_v6 = vld [vmem:[%s3740_s1 + $0x318] sm:$0xff]  }
  0x41   :  { %2564 = vmatpush3.bf16.msra.mxu1 %v2841_v7  ;;  %2571 = vmatprep.subr.bf16.mxu0 %v2842_v16  ;;  %v2889_v7 = vld [vmem:[%s3740_s1 + $0x398] sm:$0xff]   ;;  %v2898_v16 = vld [vmem:[%s3740_s1 + $0x370] sm:$0xff]  }
  0x42   :  { %2593 = vmatprep.subr.bf16.mxu1 %v2843_v17  ;;  %v2899_v17 = vld [vmem:[%s3740_s1 + $0x3f0] sm:$0xff]  }
  0x43   :  { %1732 = vmatmul.mubr.bf16.vlgmr.msra.gmra.mrb[4].mxu0 %v56_v14  ;;  %v2896_v14 = vld [vmem:[%s3740_s1 + $0x328] sm:$0xff]  }
  0x44   :  { %1772 = vmatmul.mubr.bf16.vlgmr.msra.gmra.mrb[4].mxu1 %v58_v15  ;;  %2572 = vmatpush3.bf16.msra.mxu0 %v2844_v18  ;;  %v2897_v15 = vld [vmem:[%s3740_s1 + $0x3a8] sm:$0xff]   ;;  %v2900_v18 = vld [vmem:[%s3740_s1 + $0x330] sm:$0xff]  }
  0x45   :  { %2594 = vmatpush3.bf16.msra.mxu1 %v2845_v19  ;;  %2573 = vmatprep.subr.bf16.mxu0 %v2846_v20  ;;  %v2901_v19 = vld [vmem:[%s3740_s1 + $0x3b0] sm:$0xff]   ;;  %v2902_v20 = vld [vmem:[%s3740_s1 + $0x378] sm:$0xff]  }
  0x46   :  { %2595 = vmatprep.subr.bf16.mxu1 %v2847_v21  ;;  %1811 = vmatprep.mubr.bf16.mxu0 %v61_v49  ;;  %v2903_v21 = vld [vmem:[%s3740_s1 + $0x3f8] sm:$0xff]   ;;  %v2923_v49 = vld [vmem:[%s3740_s1 + $0x4e0] sm:$0xff]  }
  0x47   :  { %1851 = vmatprep.mubr.bf16.mxu1 %v63_v53  ;;  %v2927_v53 = vld [vmem:[%s3740_s1 + $0x4e8] sm:$0xff]  }
  0x48   :  { %2574 = vmatpush3.bf16.msra.mxu0 %v2848_v22  ;;  %v2904_v22 = vld [vmem:[%s3740_s1 + $0x338] sm:$0xff]  }
  0x49   :  { %2596 = vmatpush3.bf16.msra.mxu1 %v2849_v23  ;;  %2575 = vmatprep.subr.bf16.mxu0 %v2850_v24  ;;  %v2905_v23 = vld [vmem:[%s3740_s1 + $0x3b8] sm:$0xff]   ;;  %v41_v24 = vld [vmem:[%s3739_s0 + $0x68] sm:$0xff] }
  0x4a   :  { %2597 = vmatprep.subr.bf16.mxu1 %v2851_v25  ;;  %v43_v25 = vld [vmem:[%s3739_s0 + $0x78] sm:$0xff] }
  0x4c   :  { %2576 = vmatpush3.bf16.msra.mxu0 %v2852_v26  ;;  %v40_v26 = vld [vmem:[%s3739_s0 + $0x60] sm:$0xff] }
  0x4d   :  { %2598 = vmatpush3.bf16.msra.mxu1 %v2853_v27  ;;  %2577 = vmatprep.subr.bf16.mxu0 %v2854_v28  ;;  %v65_v27 = vpack.c.bf16 %v41_v24, %v41_v24  ;;  %v67_v28 = vpack.c.bf16 %v43_v25, %v43_v25  ;;  %v2954_v24 = vld [vmem:[%s3740_s1 + $0x560] sm:$0xff]  }
  0x4e   :  { %2599 = vmatprep.subr.bf16.mxu1 %v2855_v29  ;;  %v64_v29 = vpack.c.bf16 %v40_v26, %v40_v26  ;;  %v2955_v25 = vld [vmem:[%s3740_s1 + $0x5e0] sm:$0xff]  }
  0x4f   :  { %v2956_v26 = vld [vmem:[%s3740_s1 + $0x520] sm:$0xff]  }
  0x50   :  { %2578 = vmatpush3.bf16.msra.mxu0 %v2856_v30  ;;  %v42_v30 = vld [vmem:[%s3739_s0 + $0x70] sm:$0xff] }
  0x51   :  { %2600 = vmatpush3.bf16.msra.mxu1 %v2857_v31  ;;  %2579 = vmatprep.subr.bf16.mxu0 %v2858_v32  ;;  %v66_v31 = vpack.c.bf16 %v42_v30, %v42_v30  ;;  %v2906_v32 = vld [vmem:[%s3740_s1 + $0x440] sm:$0xff]   ;;  %v2960_v30 = vld [vmem:[%s3740_s1 + $0x528] sm:$0xff]  }
  0x52   :  { %2601 = vmatprep.subr.bf16.mxu1 %v2859_v33  ;;  %v2907_v33 = vld [vmem:[%s3740_s1 + $0x4c0] sm:$0xff]  }
  0x54   :  { %2580 = vmatpush3.bf16.msra.mxu0 %v2860_v34  ;;  %v2908_v34 = vld [vmem:[%s3740_s1 + $0x400] sm:$0xff]  }
  0x55   :  { %2602 = vmatpush3.bf16.msra.mxu1 %v2861_v35  ;;  %2581 = vmatprep.subr.bf16.mxu0 %v2862_v36  ;;  %v2909_v35 = vld [vmem:[%s3740_s1 + $0x480] sm:$0xff]   ;;  %v2910_v36 = vld [vmem:[%s3740_s1 + $0x448] sm:$0xff]  }
  0x56   :  { %2603 = vmatprep.subr.bf16.mxu1 %v2863_v37  ;;  %v2911_v37 = vld [vmem:[%s3740_s1 + $0x4c8] sm:$0xff]  }
  0x58   :  { %2582 = vmatpush3.bf16.msra.mxu0 %v2864_v38  ;;  %v2912_v38 = vld [vmem:[%s3740_s1 + $0x408] sm:$0xff]  }
  0x59   :  { %2604 = vmatpush3.bf16.msra.mxu1 %v2865_v39  ;;  %2583 = vmatprep.subr.bf16.mxu0 %v2866_v40  ;;  %v2913_v39 = vld [vmem:[%s3740_s1 + $0x488] sm:$0xff]   ;;  %v2914_v40 = vld [vmem:[%s3740_s1 + $0x450] sm:$0xff]  }
  0x5a   :  { %2605 = vmatprep.subr.bf16.mxu1 %v2867_v41  ;;  %v2915_v41 = vld [vmem:[%s3740_s1 + $0x4d0] sm:$0xff]  }
  0x5c   :  { %2584 = vmatpush3.bf16.msra.mxu0 %v2868_v42  ;;  %v2916_v42 = vld [vmem:[%s3740_s1 + $0x410] sm:$0xff]  }
  0x5d   :  { %2606 = vmatpush3.bf16.msra.mxu1 %v2869_v43  ;;  %2585 = vmatprep.subr.bf16.mxu0 %v2870_v44  ;;  %v2917_v43 = vld [vmem:[%s3740_s1 + $0x490] sm:$0xff]   ;;  %v2918_v44 = vld [vmem:[%s3740_s1 + $0x458] sm:$0xff]  }
  0x5e   :  { %2607 = vmatprep.subr.bf16.mxu1 %v2871_v45  ;;  %v2919_v45 = vld [vmem:[%s3740_s1 + $0x4d8] sm:$0xff]  }
  0x60   :  { %2586 = vmatpush3.bf16.msra.mxu0 %v2872_v46  ;;  %v2920_v46 = vld [vmem:[%s3740_s1 + $0x418] sm:$0xff]  }
  0x61   :  { %2608 = vmatpush3.bf16.msra.mxu1 %v2873_v47  ;;  %2615 = vmatprep.subr.bf16.mxu0 %v2874_v56  ;;  %v2921_v47 = vld [vmem:[%s3740_s1 + $0x498] sm:$0xff]   ;;  %v2930_v56 = vld [vmem:[%s3740_s1 + $0x470] sm:$0xff]  }
  0x62   :  { %2637 = vmatprep.subr.bf16.mxu1 %v2875_v57  ;;  %v2931_v57 = vld [vmem:[%s3740_s1 + $0x4f0] sm:$0xff]  }
  0x63   :  { %1812 = vmatmul.mubr.bf16.vlgmr.msra.gmra.mrb[8].mxu0 %v60_v54  ;;  %v2928_v54 = vld [vmem:[%s3740_s1 + $0x428] sm:$0xff]  }
  0x64   :  { %1852 = vmatmul.mubr.bf16.vlgmr.msra.gmra.mrb[8].mxu1 %v62_v55  ;;  %2616 = vmatpush3.bf16.msra.mxu0 %v2876_v58  ;;  %v2929_v55 = vld [vmem:[%s3740_s1 + $0x4a8] sm:$0xff]   ;;  %v2932_v58 = vld [vmem:[%s3740_s1 + $0x430] sm:$0xff]  }
  0x65   :  { %2638 = vmatpush3.bf16.msra.mxu1 %v2877_v59  ;;  %2617 = vmatprep.subr.bf16.mxu0 %v2878_v60  ;;  %v2933_v59 = vld [vmem:[%s3740_s1 + $0x4b0] sm:$0xff]   ;;  %v2934_v60 = vld [vmem:[%s3740_s1 + $0x478] sm:$0xff]  }
  0x66   :  { %2639 = vmatprep.subr.bf16.mxu1 %v2879_v61  ;;  %1891 = vmatprep.mubr.bf16.mxu0 %v65_v27  ;;  %v2935_v61 = vld [vmem:[%s3740_s1 + $0x4f8] sm:$0xff]   ;;  %v2957_v27 = vld [vmem:[%s3740_s1 + $0x5a0] sm:$0xff]  }
  0x67   :  { %1931 = vmatprep.mubr.bf16.mxu1 %v67_v28  ;;  %v2958_v28 = vld [vmem:[%s3740_s1 + $0x568] sm:$0xff]  }
  0x68   :  { %2618 = vmatpush3.bf16.msra.mxu0 %v2880_v62  ;;  %v2936_v62 = vld [vmem:[%s3740_s1 + $0x438] sm:$0xff]  }
  0x69   :  { %2640 = vmatpush3.bf16.msra.mxu1 %v2881_v63  ;;  %2619 = vmatprep.subr.bf16.mxu0 %v2882_v0  ;;  %v2937_v63 = vld [vmem:[%s3740_s1 + $0x4b8] sm:$0xff]   ;;  %v45_v0 = vld [vmem:[%s3739_s0 + $0x88] sm:$0xff] }
  0x6a   :  { %2641 = vmatprep.subr.bf16.mxu1 %v2883_v1  ;;  %v47_v1 = vld [vmem:[%s3739_s0 + $0x98] sm:$0xff] }
  0x6c   :  { %2620 = vmatpush3.bf16.msra.mxu0 %v2884_v2  ;;  %v69_v2 = vpack.c.bf16 %v45_v0, %v45_v0 }
  0x6d   :  { %2642 = vmatpush3.bf16.msra.mxu1 %v2885_v3  ;;  %2621 = vmatprep.subr.bf16.mxu0 %v2886_v4  ;;  %v71_v3 = vpack.c.bf16 %v47_v1, %v47_v1  ;;  %v44_v4 = vld [vmem:[%s3739_s0 + $0x80] sm:$0xff] }
  0x6e   :  { %2643 = vmatprep.subr.bf16.mxu1 %v2887_v5  ;;  %v46_v5 = vld [vmem:[%s3739_s0 + $0x90] sm:$0xff] }
  0x70   :  { %2622 = vmatpush3.bf16.msra.mxu0 %v2888_v6  ;;  %v68_v6 = vpack.c.bf16 %v44_v4, %v44_v4 }
  0x71   :  { %2644 = vmatpush3.bf16.msra.mxu1 %v2889_v7  ;;  %2623 = vmatprep.subr.bf16.mxu0 %v2890_v8  ;;  %v70_v7 = vpack.c.bf16 %v46_v5, %v46_v5  ;;  %v2938_v8 = vld [vmem:[%s3740_s1 + $0x540] sm:$0xff]  }
  0x72   :  { %2645 = vmatprep.subr.bf16.mxu1 %v2891_v9  ;;  %v2939_v9 = vld [vmem:[%s3740_s1 + $0x5c0] sm:$0xff]  }
  0x74   :  { %2624 = vmatpush3.bf16.msra.mxu0 %v2892_v10  ;;  %v2940_v10 = vld [vmem:[%s3740_s1 + $0x500] sm:$0xff]  }
  0x75   :  { %2646 = vmatpush3.bf16.msra.mxu1 %v2893_v11  ;;  %2625 = vmatprep.subr.bf16.mxu0 %v2894_v12  ;;  %v2941_v11 = vld [vmem:[%s3740_s1 + $0x580] sm:$0xff]   ;;  %v2942_v12 = vld [vmem:[%s3740_s1 + $0x548] sm:$0xff]  }
  0x76   :  { %2647 = vmatprep.subr.bf16.mxu1 %v2895_v13  ;;  %v2943_v13 = vld [vmem:[%s3740_s1 + $0x5c8] sm:$0xff]  }
  0x78   :  { %2626 = vmatpush3.bf16.msra.mxu0 %v2896_v14  ;;  %v2944_v14 = vld [vmem:[%s3740_s1 + $0x508] sm:$0xff]  }
  0x79   :  { %2648 = vmatpush3.bf16.msra.mxu1 %v2897_v15  ;;  %2627 = vmatprep.subr.bf16.mxu0 %v2898_v16  ;;  %v2945_v15 = vld [vmem:[%s3740_s1 + $0x588] sm:$0xff]   ;;  %v2946_v16 = vld [vmem:[%s3740_s1 + $0x550] sm:$0xff]  }
  0x7a   :  { %2649 = vmatprep.subr.bf16.mxu1 %v2899_v17  ;;  %v2947_v17 = vld [vmem:[%s3740_s1 + $0x5d0] sm:$0xff]  }
  0x7c   :  { %2628 = vmatpush3.bf16.msra.mxu0 %v2900_v18  ;;  %v2948_v18 = vld [vmem:[%s3740_s1 + $0x510] sm:$0xff]  }
  0x7d   :  { %2650 = vmatpush3.bf16.msra.mxu1 %v2901_v19  ;;  %2629 = vmatprep.subr.bf16.mxu0 %v2902_v20  ;;  %v2949_v19 = vld [vmem:[%s3740_s1 + $0x590] sm:$0xff]   ;;  %v2950_v20 = vld [vmem:[%s3740_s1 + $0x558] sm:$0xff]  }
  0x7e   :  { %2651 = vmatprep.subr.bf16.mxu1 %v2903_v21  ;;  %v2951_v21 = vld [vmem:[%s3740_s1 + $0x5d8] sm:$0xff]  }
  0x80   :  { %2630 = vmatpush3.bf16.msra.mxu0 %v2904_v22  ;;  %v2952_v22 = vld [vmem:[%s3740_s1 + $0x518] sm:$0xff]  }
  0x81   :  { %2652 = vmatpush3.bf16.msra.mxu1 %v2905_v23  ;;  %2659 = vmatprep.subr.bf16.mxu0 %v2906_v32  ;;  %v2953_v23 = vld [vmem:[%s3740_s1 + $0x598] sm:$0xff]   ;;  %v2962_v32 = vld [vmem:[%s3740_s1 + $0x570] sm:$0xff]  }
  0x82   :  { %2681 = vmatprep.subr.bf16.mxu1 %v2907_v33  ;;  %v2963_v33 = vld [vmem:[%s3740_s1 + $0x5f0] sm:$0xff]  }
  0x83   :  { %1892 = vmatmul.mubr.bf16.vlgmr.msra.gmra.mrb[12].mxu0 %v64_v29  ;;  %v2959_v29 = vld [vmem:[%s3740_s1 + $0x5e8] sm:$0xff]  }
  0x84   :  { %1932 = vmatmul.mubr.bf16.vlgmr.msra.gmra.mrb[12].mxu1 %v66_v31  ;;  %2660 = vmatpush3.bf16.msra.mxu0 %v2908_v34  ;;  %v2961_v31 = vld [vmem:[%s3740_s1 + $0x5a8] sm:$0xff]   ;;  %v2964_v34 = vld [vmem:[%s3740_s1 + $0x530] sm:$0xff]  }
  0x85   :  { %2682 = vmatpush3.bf16.msra.mxu1 %v2909_v35  ;;  %2661 = vmatprep.subr.bf16.mxu0 %v2910_v36  ;;  %v2965_v35 = vld [vmem:[%s3740_s1 + $0x5b0] sm:$0xff]   ;;  %v2966_v36 = vld [vmem:[%s3740_s1 + $0x578] sm:$0xff]  }
  0x86   :  { %2683 = vmatprep.subr.bf16.mxu1 %v2911_v37  ;;  %1971 = vmatprep.mubr.bf16.mxu0 %v69_v2  ;;  %v2967_v37 = vld [vmem:[%s3740_s1 + $0x5f8] sm:$0xff]  }
  0x87   :  { %2011 = vmatprep.mubr.bf16.mxu1 %v71_v3 }
  0x88   :  { %2662 = vmatpush3.bf16.msra.mxu0 %v2912_v38  ;;  %v2968_v38 = vld [vmem:[%s3740_s1 + $0x538] sm:$0xff]  }
  0x89   :  { %2684 = vmatpush3.bf16.msra.mxu1 %v2913_v39  ;;  %2663 = vmatprep.subr.bf16.mxu0 %v2914_v40  ;;  %v2969_v39 = vld [vmem:[%s3740_s1 + $0x5b8] sm:$0xff]   ;;  %v49_v40 = vld [vmem:[%s3739_s0 + $0xa8] sm:$0xff] }
  0x8a   :  { %2685 = vmatprep.subr.bf16.mxu1 %v2915_v41  ;;  %v73_v41 = vpack.c.bf16 %v49_v40, %v49_v40 }
  0x8c   :  { %2664 = vmatpush3.bf16.msra.mxu0 %v2916_v42  ;;  %v51_v42 = vld [vmem:[%s3739_s0 + $0xb8] sm:$0xff] }
  0x8d   :  { %2686 = vmatpush3.bf16.msra.mxu1 %v2917_v43  ;;  %2665 = vmatprep.subr.bf16.mxu0 %v2918_v44  ;;  %v48_v43 = vld [vmem:[%s3739_s0 + $0xa0] sm:$0xff]  ;;  %v50_v44 = vld [vmem:[%s3739_s0 + $0xb0] sm:$0xff] }
  0x8e   :  { %2687 = vmatprep.subr.bf16.mxu1 %v2919_v45  ;;  %v75_v45 = vpack.c.bf16 %v51_v42, %v51_v42 }
  0x90   :  { %2666 = vmatpush3.bf16.msra.mxu0 %v2920_v46  ;;  %v72_v46 = vpack.c.bf16 %v48_v43, %v48_v43 }
  0x91   :  { %2688 = vmatpush3.bf16.msra.mxu1 %v2921_v47  ;;  %2667 = vmatprep.subr.bf16.mxu0 %v2922_v48  ;;  %v74_v47 = vpack.c.bf16 %v50_v44, %v50_v44 }
  0x92   :  { %2689 = vmatprep.subr.bf16.mxu1 %v2923_v49 }
  0x94   :  { %2668 = vmatpush3.bf16.msra.mxu0 %v2924_v50 }
  0x95   :  { %2690 = vmatpush3.bf16.msra.mxu1 %v2925_v51  ;;  %2669 = vmatprep.subr.bf16.mxu0 %v2926_v52 }
  0x96   :  { %2691 = vmatprep.subr.bf16.mxu1 %v2927_v53 }
  0x98   :  { %2670 = vmatpush3.bf16.msra.mxu0 %v2928_v54 }
  0x99   :  { %2692 = vmatpush3.bf16.msra.mxu1 %v2929_v55  ;;  %2671 = vmatprep.subr.bf16.mxu0 %v2930_v56 }
  0x9a   :  { %2693 = vmatprep.subr.bf16.mxu1 %v2931_v57 }
  0x9c   :  { %2672 = vmatpush3.bf16.msra.mxu0 %v2932_v58 }
  0x9d   :  { %2694 = vmatpush3.bf16.msra.mxu1 %v2933_v59  ;;  %2673 = vmatprep.subr.bf16.mxu0 %v2934_v60 }
  0x9e   :  { %2695 = vmatprep.subr.bf16.mxu1 %v2935_v61 }
  0xa0   :  { %2674 = vmatpush3.bf16.msra.mxu0 %v2936_v62 }
  0xa1   :  { %2696 = vmatpush3.bf16.msra.mxu1 %v2937_v63  ;;  %2703 = vmatprep.subr.bf16.mxu0 %v2938_v8 }
  0xa2   :  { %2725 = vmatprep.subr.bf16.mxu1 %v2939_v9 }
  0xa3   :  { %1972 = vmatmul.mubr.bf16.vlgmr.msra.gmra.mrb[16].mxu0 %v68_v6 }
  0xa4   :  { %2012 = vmatmul.mubr.bf16.vlgmr.msra.gmra.mrb[16].mxu1 %v70_v7  ;;  %2704 = vmatpush3.bf16.msra.mxu0 %v2940_v10 }
  0xa5   :  { %2726 = vmatpush3.bf16.msra.mxu1 %v2941_v11  ;;  %2705 = vmatprep.subr.bf16.mxu0 %v2942_v12 }
  0xa6   :  { %2727 = vmatprep.subr.bf16.mxu1 %v2943_v13  ;;  %2051 = vmatprep.mubr.bf16.mxu0 %v73_v41 }
  0xa7   :  { %2091 = vmatprep.mubr.bf16.mxu1 %v75_v45 }
  0xa8   :  { %2706 = vmatpush3.bf16.msra.mxu0 %v2944_v14 }
  0xa9   :  { %2728 = vmatpush3.bf16.msra.mxu1 %v2945_v15  ;;  %2707 = vmatprep.subr.bf16.mxu0 %v2946_v16 }
  0xaa   :  { %2729 = vmatprep.subr.bf16.mxu1 %v2947_v17 }
  0xac   :  { %2708 = vmatpush3.bf16.msra.mxu0 %v2948_v18 }
  0xad   :  { %2730 = vmatpush3.bf16.msra.mxu1 %v2949_v19  ;;  %2709 = vmatprep.subr.bf16.mxu0 %v2950_v20 }
  0xae   :  { %2731 = vmatprep.subr.bf16.mxu1 %v2951_v21 }
  0xb0   :  { %2710 = vmatpush3.bf16.msra.mxu0 %v2952_v22 }
  0xb1   :  { %2732 = vmatpush3.bf16.msra.mxu1 %v2953_v23  ;;  %2711 = vmatprep.subr.bf16.mxu0 %v2954_v24 }
  0xb2   :  { %2733 = vmatprep.subr.bf16.mxu1 %v2955_v25 }
  0xb4   :  { %2712 = vmatpush3.bf16.msra.mxu0 %v2956_v26 }
  0xb5   :  { %2734 = vmatpush3.bf16.msra.mxu1 %v2957_v27  ;;  %2713 = vmatprep.subr.bf16.mxu0 %v2958_v28 }
  0xb6   :  { %2735 = vmatprep.subr.bf16.mxu1 %v2959_v29 }
  0xb8   :  { %2714 = vmatpush3.bf16.msra.mxu0 %v2960_v30 }
  0xb9   :  { %2736 = vmatpush3.bf16.msra.mxu1 %v2961_v31  ;;  %2715 = vmatprep.subr.bf16.mxu0 %v2962_v32 }
  0xba   :  { %2737 = vmatprep.subr.bf16.mxu1 %v2963_v33 }
  0xbc   :  { %2716 = vmatpush3.bf16.msra.mxu0 %v2964_v34 }
  0xbd   :  { %2738 = vmatpush3.bf16.msra.mxu1 %v2965_v35  ;;  %2717 = vmatprep.subr.bf16.mxu0 %v2966_v36 }
  0xbe   :  { %2739 = vmatprep.subr.bf16.mxu1 %v2967_v37 }
  0xc0   :  { %2718 = vmatpush3.bf16.msra.mxu0 %v2968_v38 }
  0xc1   :  { %2740 = vmatpush3.bf16.msra.mxu1 %v2969_v39 }
  0xc3   :  { %2052 = vmatmul.mubr.bf16.vlgmr.msra.gmra.mrb[20].mxu0 %v72_v46 }
  0xc4   :  { %2092 = vmatmul.mubr.bf16.vlgmr.msra.gmra.mrb[20].mxu1 %v74_v47 }
  0xc5   :  { %12 = vsyncpa [#allocation3], 0  ;;  %v2280_v50 = vld [vmem:[%s3741_s2] ss:$0 sm:$0xff]  ;;  %v3006_v10 = vmov 0.0   ;;  %v2971_v11 = vld [vmem:[%s3742_s3 + $0x8] sm:$0xff]  }
  0xc6   :  { %v2970_v9 = vld [vmem:[%s3742_s3] sm:$0xff]   ;;  %2755 = vmatprep.subr.bf16.mxu0 %v3006_v10  ;;  %2767 = vmatprep.subr.bf16.mxu1 %v3006_v10  ;;  %v2972_v12 = vld [vmem:[%s3742_s3 + $0x10] sm:$0xff]   ;;  %v2973_v13 = vld [vmem:[%s3742_s3 + $0x18] sm:$0xff]   ;;  %vm3007_vm0 = vmmov 0   ;;  %vm2140_vm1 = vcmask 523264   ;;  %vm2209_vm2 = vcmask 261120  }
  0xc7   :  { %2756 = vmatpush3.bf16.msra.mxu0 %v2970_v9  ;;  %2763 = vmatprep.mubr.msk.bf16.mxu0 %vm3007_vm0, %v3006_v10  ;;  %v2974_v14 = vld [vmem:[%s3744_s5] sm:$0xff]   ;;  %vm2253_vm3 = vcmask 80896  }
  0xc8   :  { %2757 = vmatprep.subr.bf16.mxu0 %v3006_v10  ;;  %2771 = vmatprep.mubr.msk.bf16.mxu1 %vm3007_vm0, %v3006_v10 }
  0xc9   :  { %2768 = vmatpush3.bf16.msra.mxu1 %v2974_v14 }
  0xca   :  { %2769 = vmatprep.subr.bf16.mxu1 %v3006_v10 }
  0xcb   :  { %2758 = vmatpush3.bf16.msra.mxu0 %v2971_v11 }
  0xcc   :  { %2759 = vmatprep.subr.bf16.mxu0 %v3006_v10 }
  0xcf   :  { %2760 = vmatpush3.bf16.msra.mxu0 %v2972_v12 }
  0xd0   :  { %2761 = vmatprep.subr.bf16.mxu0 %v3006_v10  ;;  %v2479_v10 = vld [vmem:[%s3745_s6] ss:$0 sm:$0xff] }
  0xd3   :  { %2762 = vmatpush3.bf16.msra.mxu0 %v2973_v13 }
  0xf6   :  { %v2499_v48 = vpop.f32.mrb[0].mxu0 }
  0xf7   :  { %v2521_v49 = vpop.f32.mrb[0].mxu1  ;;  %v2500_v51 = vpop.f32.mrb[1].mxu0 }
  0xf8   :  { %v2522_v52 = vpop.f32.mrb[1].mxu1  ;;  %v2501_v53 = vadd.f32 %v2500_v51, %v2499_v48  ;;  %v2502_v55 = vpop.f32.mrb[2].mxu0 }
  0xf9   :  { %v2523_v54 = vadd.f32 %v2522_v52, %v2521_v49  ;;  %v2524_v56 = vpop.f32.mrb[2].mxu1  ;;  %v2503_v57 = vpop.f32.mrb[3].mxu0 }
  0xfa   :  { %v2525_v58 = vpop.f32.mrb[3].mxu1  ;;  %v1654_v59 = vadd.f32 %v2501_v53, %v2280_v50 }
  0xfc   :  { %v1694_v60 = vadd.f32 %v2523_v54, %v1654_v59 }
 0x116   :  { %v2543_v61 = vpop.f32.mrb[4].mxu0 }
 0x117   :  { %v2565_v62 = vpop.f32.mrb[4].mxu1  ;;  %v2544_v63 = vpop.f32.mrb[5].mxu0 }
 0x118   :  { %v2545_v0 = vadd.f32 %v2544_v63, %v2543_v61  ;;  %v2566_v1 = vpop.f32.mrb[5].mxu1  ;;  %v2546_v2 = vpop.f32.mrb[6].mxu0 }
 0x119   :  { %v2567_v3 = vadd.f32 %v2566_v1, %v2565_v62  ;;  %v2568_v4 = vpop.f32.mrb[6].mxu1  ;;  %v2547_v5 = vpop.f32.mrb[7].mxu0  ;;  %v2975_v1 = vld [vmem:[%s3744_s5 + $0x8] sm:$0xff]   ;;  %v2473_v2 = vld [vmem:[%s3743_s4] ss:$0 sm:$0xff]  ;;  %s3008_s4 = smov [#allocation2]  }
 0x11a   :  { %v1734_v6 = vadd.f32 %v2545_v0, %v1694_v60  ;;  %v2569_v7 = vpop.f32.mrb[7].mxu1  ;;  %2770 = vmatpush3.bf16.msra.mxu1 %v2975_v1  ;;  %s2272_s5 = sshll.u32 %s3008_s4, 4  ;;  %s2273_s5 = int_to_ptr.vmem [resolvable:$true] %s2272_s5 }
 0x11b   :  { %s2982_s6 = scalar_lea.vmem %s2273_s5, 128  ;;  %p2987_p1 = scmp.lt.s32.totalorder %s2273_s5, %s2273_s5 }
 0x11c   :  { %v1774_v8 = vadd.f32 %v2567_v3, %v1734_v6  ;;  %p2983_p0 = scmp.ne.s32.totalorder %s2273_s5, %s2982_s6  ;;  %p2988_p2 = scmp.lt.s32.totalorder %s2982_s6, %s2982_s6 }
 0x11e   :  { %p2989_p3 = por %p2988_p2, %p2987_p1 }
 0x120   :  { %p2990_p4 = pnand %p2989_p3, %p2983_p0 }
 0x136   :  { %v2587_v15 = vpop.f32.mrb[8].mxu0 }
 0x137   :  { %v2609_v16 = vpop.f32.mrb[8].mxu1  ;;  %v2588_v17 = vpop.f32.mrb[9].mxu0 }
 0x138   :  { %v2589_v18 = vadd.f32 %v2588_v17, %v2587_v15  ;;  %v2610_v19 = vpop.f32.mrb[9].mxu1  ;;  %v2590_v20 = vpop.f32.mrb[10].mxu0 }
 0x139   :  { %v2611_v21 = vadd.f32 %v2610_v19, %v2609_v16  ;;  %v2612_v22 = vpop.f32.mrb[10].mxu1  ;;  %v2591_v23 = vpop.f32.mrb[11].mxu0 }
 0x13a   :  { %v1814_v24 = vadd.f32 %v2589_v18, %v1774_v8  ;;  %v2613_v25 = vpop.f32.mrb[11].mxu1 }
 0x13c   :  { %v1854_v26 = vadd.f32 %v2611_v21, %v1814_v24 }
 0x156   :  { %v2631_v27 = vpop.f32.mrb[12].mxu0 }
 0x157   :  { %v2653_v28 = vpop.f32.mrb[12].mxu1  ;;  %v2632_v29 = vpop.f32.mrb[13].mxu0 }
 0x158   :  { %v2654_v30 = vpop.f32.mrb[13].mxu1  ;;  %v2633_v31 = vadd.f32 %v2632_v29, %v2631_v27  ;;  %v2634_v33 = vpop.f32.mrb[14].mxu0 }
 0x159   :  { %v2655_v32 = vadd.f32 %v2654_v30, %v2653_v28  ;;  %v2656_v34 = vpop.f32.mrb[14].mxu1  ;;  %v2635_v35 = vpop.f32.mrb[15].mxu0 }
 0x15a   :  { %v2657_v36 = vpop.f32.mrb[15].mxu1  ;;  %v1894_v37 = vadd.f32 %v2633_v31, %v1854_v26 }
 0x15c   :  { %v1934_v38 = vadd.f32 %v2655_v32, %v1894_v37 }
 0x176   :  { %v2675_v39 = vpop.f32.mrb[16].mxu0 }
 0x177   :  { %v2697_v40 = vpop.f32.mrb[16].mxu1  ;;  %v2676_v41 = vpop.f32.mrb[17].mxu0 }
 0x178   :  { %v2677_v42 = vadd.f32 %v2676_v41, %v2675_v39  ;;  %v2698_v43 = vpop.f32.mrb[17].mxu1  ;;  %v2678_v44 = vpop.f32.mrb[18].mxu0 }
 0x179   :  { %v2699_v45 = vadd.f32 %v2698_v43, %v2697_v40  ;;  %v2700_v46 = vpop.f32.mrb[18].mxu1  ;;  %v2679_v47 = vpop.f32.mrb[19].mxu0 }
 0x17a   :  { %v1974_v48 = vadd.f32 %v2677_v42, %v1934_v38  ;;  %v2701_v49 = vpop.f32.mrb[19].mxu1 }
 0x17c   :  { %v2014_v50 = vadd.f32 %v2699_v45, %v1974_v48 }
 0x196   :  { %v2719_v51 = vpop.f32.mrb[20].mxu0 }
 0x197   :  { %v2741_v52 = vpop.f32.mrb[20].mxu1  ;;  %v2720_v53 = vpop.f32.mrb[21].mxu0 }
 0x198   :  { %v2721_v54 = vadd.f32 %v2720_v53, %v2719_v51  ;;  %v2742_v55 = vpop.f32.mrb[21].mxu1  ;;  %v2722_v56 = vpop.f32.mrb[22].mxu0 }
 0x199   :  { %v2743_v57 = vadd.f32 %v2742_v55, %v2741_v52  ;;  %v2744_v58 = vpop.f32.mrb[22].mxu1  ;;  %v2723_v59 = vpop.f32.mrb[23].mxu0 }
 0x19a   :  { %v2054_v60 = vadd.f32 %v2721_v54, %v2014_v50  ;;  %v2745_v61 = vpop.f32.mrb[23].mxu1 }
 0x19c   :  { %v2094_v62 = vadd.f32 %v2743_v57, %v2054_v60 }
 0x19e   :  { %2976 = vtanh.f32 %v2094_v62 }
 0x1a8   :  { %v2977_v63 = vpop.eup %2976 }
 0x1a9   :  { %v2100_v0 = vpack.c.bf16 %v2977_v63, %v2977_v63 }
 0x1ab   :  { %2764 = vmatmul.mubr.msk.bf16.vlgmr.msra.gmra.mrb[24].mxu0 %vm2140_vm1, %v2100_v0 }
 0x27e   :  { %v2178_v3 = vpop.f32.mrb[24].mxu0 }
 0x27f   :  { %v2179_v4 = vadd.f32 %v2473_v2, %v2178_v3  ;;  %v2765_v5 = vpop.f32.mrb[25].mxu0 }
 0x280   :  { %v2181_v6 = vpop.f32.mrb[26].mxu0 }
 0x281   :  { %v2184_v7 = vmax.f32 %v2179_v4, 0.0  ;;  %v2766_v8 = vpop.f32.mrb[27].mxu0 }
 0x283   :  { %v2185_v9 = vpack.c.bf16 %v2184_v7, %v2184_v7 }
 0x285   :  { %2772 = vmatmul.mubr.msk.bf16.vlgmr.msra.gmra.mrb[24].mxu1 %vm2209_vm2, %v2185_v9 }
 0x358   :  { %v2247_v11 = vpop.f32.mrb[24].mxu1 }
 0x359   :  { %v2248_v12 = vadd.f32 %v2479_v10, %v2247_v11  ;;  %v2773_v13 = vpop.f32.mrb[25].mxu1 }
 0x35a   :  { %v2250_v14 = vpop.f32.mrb[26].mxu1 }
 0x35b   :  { %v2774_v15 = vpop.f32.mrb[27].mxu1  ;;  %v2254_v16 = vsel %vm2253_vm3, %v2248_v12, -inf }
 0x35c   :  { %2255 = vmax.xlane.f32.xlu0 %v2254_v16 }
 0x3e9   :  { %v2256_v17 = vpop.xlane.xlu0 %2255 }
 0x3ea   :  { %v2257_v18 = vsub.f32 %v2248_v12, %v2256_v17 }
 0x3ec   :  { %v2258_v19 = vmul.f32 1.442695, %v2257_v18 }
 0x3ee   :  { %2978 = vpow2.f32 %v2258_v19 }
 0x3f8   :  { %v2979_v20 = vpop.eup %2978 }
 0x3f9   :  { %v2260_v21 = vsel %vm2253_vm3, %v2979_v20, 0.0 }
 0x3fa   :  { %2261 = vadd.xlane.f32.xlu0 %v2260_v21 }
 0x487   :  { %v2262_v22 = vpop.xlane.xlu0 %2261 }
 0x488   :  { %2980 = vrcp.f32 %v2262_v22 }
 0x492   :  { %v2981_v23 = vpop.eup %2980 }
 0x493   :  { %v2264_v24 = vmul.f32 %v2981_v23, %v2979_v20 }
 0x495   :  { %2265 = vst.msk [vmem:[#allocation2] sm:$0xff] %vm2253_vm3, %v2264_v24 }
 0x496   :  { %2993 = shalt.err (!%p2990_p4)
}
 0x497   :  { %s2994_s12 = scalar_lea.hbm %s3746_s7, 128 }
 0x498   :  { %p2995_p5 = scmp.ne.s32.totalorder %s3746_s7, %s2994_s12  ;;  %p2998_p6 = scmp.lt.u32.totalorder %s2994_s12, %s3746_s7 }
 0x49a   :  { %p3000_p7 = pnand %p2998_p6, %p2995_p5 }
 0x49c   :  { %3003 = shalt.err (!%p3000_p7)
}
 0x49d   :  { %2275 = dma.vmem_to_hbm [thread:$0]  %s2273_s5, 128, %s3746_s7, [#allocation3]  }
 0x49e   :  { %3004 = dma.done.wait [#allocation3], 128  }
 0x49f   :  { %3005 = vsyncadd [#allocation3], 4294967168 }
 0x4a0   :  { %2279 = vsyncpa [#allocation3], 1 }

</bundles_post_ra>
